<compile_context>
chip_gen: v5e
topology: v5e:2x2
jax: 0.10.0
libtpu: 0.0.40
codegen_flags: <defaults>
</compile_context>

<pallas_src>
import functools

import jax
import jax.numpy as jnp
from jax.experimental import pallas as pl
from jax.experimental.pallas import tpu as pltpu


# --------------------------- small helpers ----------------------------------

def _round_up(x: int, m: int) -> int:
    return ((x + m - 1) // m) * m


def _vmem_capacity_bytes() -> int:
    """Physical VMEM per TensorCore; conservative fallback if query fails."""
    try:
        cap = int(pltpu.get_tpu_info().vmem_capacity_bytes)
        if cap > 0:
            return cap
    except Exception:
        pass
    return 64 * 1024 * 1024  # v7x-sized fallback: safe on every generation


_VMEM_CAPACITY_BYTES = _vmem_capacity_bytes()
# Raise the scoped-VMEM limit to ~75% of physical (96 MiB on v5e/v6e, 48 MiB on v7x).
_VMEM_LIMIT_BYTES = max(32 * 1024 * 1024, (_VMEM_CAPACITY_BYTES * 3) // 4)
# Fused-path eligibility budget (leaves headroom for compiler scratch).
_FUSED_VMEM_BUDGET_BYTES = int(_VMEM_LIMIT_BYTES * 0.85)


def _pick_batch_tile(batch: int) -> int:
    """Row tile for the fused path: small batches stay un-tiled, large batches
    use 512/256/128-row tiles with <=10% padding waste where possible."""
    bp8 = _round_up(max(batch, 1), 8)
    if bp8 <= 512:
        return bp8
    for bm in (512, 256, 128):
        if (_round_up(batch, bm) - batch) / batch <= 0.10:
            return bm
    return 128


def _pick_row_tile(m: int) -> int:
    """Row tile for the tiled fallback (same policy as the fused path)."""
    return _pick_batch_tile(m)


def _largest_div_tile(dim_padded: int, cap: int) -> int:
    """Largest multiple of 128 that is <= cap and divides dim_padded
    (dim_padded is always a multiple of 128)."""
    t = min(cap, dim_padded)
    t = (t // 128) * 128
    t = max(t, 128)
    while dim_padded % t != 0:
        t -= 128
    return max(t, 128)


def _fused_vmem_bytes(bm, dims_p, x_itemsize, w_itemsize):
    """Conservative (2x for buffering) on-chip footprint of the fused path."""
    n = len(dims_p) - 1
    w_bytes = sum(dims_p[i] * dims_p[i + 1] for i in range(n)) * w_itemsize
    b_bytes = sum(dims_p[1:]) * 4
    x_bytes = bm * dims_p[0] * x_itemsize
    o_bytes = sum(bm * d for d in dims_p[1:]) * x_itemsize
    return 2 * (w_bytes + b_bytes + x_bytes + o_bytes)


# ------------------- fused whole-block kernel (path 1) ----------------------

def _fused_block_kernel(*refs, num_layers: int, relu_flags: tuple, emit_all: bool):
    """refs = (x, w0, b0, w1, b1, ..., out...); all VMEM-resident tiles.

    The whole Linear(+bias)(+ReLU) chain runs on one batch tile; intermediate
    activations never leave VMEM.
    """
    x_ref = refs[0]
    w_refs = [refs[1 + 2 * i] for i in range(num_layers)]
    b_refs = [refs[2 + 2 * i] for i in range(num_layers)]
    out_refs = refs[1 + 2 * num_layers:]

    act = x_ref[...]
    out_idx = 0
    for i in range(num_layers):
        w = w_refs[i][...]
        # bf16 path: operands in w.dtype, accumulation forced to f32 on the MXU.
        y = jnp.dot(act.astype(w.dtype), w, preferred_element_type=jnp.float32)
        y = y + b_refs[i][...].astype(jnp.float32)   # (1, Dp) broadcasts over rows
        if relu_flags[i]:
            y = jnp.maximum(y, 0.0)
        if emit_all or i == num_layers - 1:
            out_refs[out_idx][...] = y.astype(out_refs[out_idx].dtype)
            out_idx += 1
        act = y                                       # stays on-chip (f32)
    # TODO(synk): training-mode dropout (pltpu.prng_seed + prng_random_bits)
    # if a nonzero dropout_rate in training mode is ever required.


def _fused_call(x, weights_p, biases_p, relu_flags, bm, emit_all):
    """One pallas_call for the whole block, gridded over batch tiles of bm rows."""
    num_layers = len(weights_p)
    B, D0 = x.shape
    Bp = _round_up(max(B, 1), bm)
    D0p = weights_p[0].shape[0]
    if Bp == B and D0p == D0:
        xp = x
    else:
        xp = jnp.zeros((Bp, D0p), x.dtype).at[:B, :D0].set(x)

    grid = (Bp // bm,)

    in_arrays = [xp]
    in_specs = [pl.BlockSpec((bm, D0p), lambda m: (m, 0))]
    for w, b in zip(weights_p, biases_p):
        in_arrays += [w, b]
        # Constant index_map -> weights/biases stay resident across batch tiles.
        in_specs += [pl.BlockSpec(w.shape, lambda m: (0, 0)),
                     pl.BlockSpec(b.shape, lambda m: (0, 0))]

    if emit_all:
        emit_dims = [w.shape[1] for w in weights_p]
    else:
        emit_dims = [weights_p[-1].shape[1]]
    out_shape = tuple(jax.ShapeDtypeStruct((Bp, d), x.dtype) for d in emit_dims)
    out_specs = tuple(pl.BlockSpec((bm, d), lambda m: (m, 0)) for d in emit_dims)

    x_item = jnp.dtype(x.dtype).itemsize
    flops = int(sum(2 * Bp * w.shape[0] * w.shape[1] for w in weights_p))
    bytes_accessed = int(
        xp.size * x_item
        + sum(w.size * w.dtype.itemsize + b.size * b.dtype.itemsize
              for w, b in zip(weights_p, biases_p))
        + sum(Bp * d * x_item for d in emit_dims))
    cost = pl.CostEstimate(flops=flops, transcendentals=0,
                           bytes_accessed=bytes_accessed)

    kernel = functools.partial(
        _fused_block_kernel, num_layers=num_layers,
        relu_flags=tuple(bool(f) for f in relu_flags), emit_all=bool(emit_all))

    outs = pl.pallas_call(
        kernel,
        out_shape=out_shape,
        grid=grid,
        in_specs=in_specs,
        out_specs=out_specs,
        compiler_params=pltpu.CompilerParams(
            dimension_semantics=("parallel",),
            vmem_limit_bytes=_VMEM_LIMIT_BYTES),
        cost_estimate=cost,
    )(*in_arrays)
    if not isinstance(outs, (list, tuple)):
        outs = (outs,)
    return list(outs)


# ----------------- tiled per-layer kernel (path 2, fallback) ----------------

def _tiled_linear_kernel(x_ref, w_ref, b_ref, o_ref, acc_ref, *, apply_relu):
    k = pl.program_id(2)
    w = w_ref[...]
    prod = jnp.dot(x_ref[...].astype(w.dtype), w,
                   preferred_element_type=jnp.float32)

    @pl.when(k == 0)
    def _():
        acc_ref[...] = prod                 # direct write: no zero-init pass

    @pl.when(k != 0)
    def _():
        acc_ref[...] += prod

    @pl.when(k == pl.num_programs(2) - 1)
    def _():
        y = acc_ref[...] + b_ref[...].astype(jnp.float32)   # bias on last K step
        if apply_relu:
            y = jnp.maximum(y, 0.0)
        o_ref[...] = y.astype(o_ref.dtype)


def _pallas_linear_tiled_padded(xp, wp, bp, apply_relu, tm):
    """Padded y = x @ W + b (+ReLU). xp: (Mp, Kp), wp: (Kp, Np), bp: (1, Np).
    All feature dims already padded to multiples of 128; returns padded (Mp, Np)."""
    Mp, Kp = xp.shape
    Kp2, Np = wp.shape
    assert Kp == Kp2, (Kp, Kp2)
    # 512-class output tiles / 1024-class K tiles: ~13 MiB live footprint (f32)
    # incl. double buffers -- fits all generations with the raised VMEM limit.
    tk = _largest_div_tile(Kp, 1024)
    tn = _largest_div_tile(Np, 512)
    grid = (Mp // tm, Np // tn, Kp // tk)

    kernel = functools.partial(_tiled_linear_kernel, apply_relu=bool(apply_relu))
    x_item = jnp.dtype(xp.dtype).itemsize
    cost = pl.CostEstimate(
        flops=int(2 * Mp * Np * Kp),
        transcendentals=0,
        bytes_accessed=int(xp.size * x_item + wp.size * wp.dtype.itemsize
                           + bp.size * bp.dtype.itemsize + Mp * Np * x_item))

    out = pl.pallas_call(
        kernel,
        out_shape=jax.ShapeDtypeStruct((Mp, Np), xp.dtype),
        grid_spec=pltpu.PrefetchScalarGridSpec(
            num_scalar_prefetch=0,
            grid=grid,
            in_specs=[
                pl.BlockSpec((tm, tk), lambda i, j, k: (i, k)),
                pl.BlockSpec((tk, tn), lambda i, j, k: (k, j)),
                pl.BlockSpec((1, tn), lambda i, j, k: (0, j)),
            ],
            out_specs=pl.BlockSpec((tm, tn), lambda i, j, k: (i, j)),
            scratch_shapes=[pltpu.VMEM((tm, tn), jnp.float32)],
        ),
        compiler_params=pltpu.CompilerParams(
            dimension_semantics=("parallel", "parallel", "arbitrary"),
            vmem_limit_bytes=_VMEM_LIMIT_BYTES),
        cost_estimate=cost,
    )(xp, wp, bp)
    return out


def _tiled_chain(x, weights_p, biases_p, relu_flags, dims, collect):
    """Per-layer tiled fallback; activations stay PADDED between layers."""
    M = x.shape[0]
    tm = _pick_row_tile(M)
    Mp = _round_up(M, tm)
    D0, D0p = dims[0], weights_p[0].shape[0]
    act_p = jnp.zeros((Mp, D0p), x.dtype).at[:M, :D0].set(x)

    outs = []
    n = len(weights_p)
    for i in range(n):
        act_p = _pallas_linear_tiled_padded(
            act_p, weights_p[i], biases_p[i], relu_flags[i], tm)
        if collect or i == n - 1:
            outs.append(act_p[:M, :dims[i + 1]])
    return tuple(outs)


# --------------------------- jitted dispatcher -------------------------------

@functools.partial(jax.jit,
                   static_argnames=("relu_flags", "dims", "force_tiled", "only_final"))
def _linear_block_forward(x, weights_p, biases_p, *, relu_flags, dims,
                          force_tiled=False, only_final=False):
    B = x.shape[0]
    dims_p = tuple(w.shape[0] for w in weights_p) + (weights_p[-1].shape[1],)
    bm = _pick_batch_tile(B)
    x_item = jnp.dtype(x.dtype).itemsize
    w_item = jnp.dtype(weights_p[0].dtype).itemsize
    fused_ok = (not force_tiled) and (
        _fused_vmem_bytes(bm, dims_p, x_item, w_item) <= _FUSED_VMEM_BUDGET_BYTES)

    if fused_ok:
        padded = _fused_call(x, list(weights_p), list(biases_p),
                             relu_flags, bm, emit_all=not only_final)
        out_dims = dims[1:] if not only_final else (dims[-1],)
        return tuple(o[:B, :d] for o, d in zip(padded, out_dims))
    return _tiled_chain(x, list(weights_p), list(biases_p), relu_flags, dims,
                        collect=not only_final)


# ------------------------------ module port ---------------------------------

class LinearBlockPallas:
    """JAX/Pallas port of the PyTorch LinearBlock.

    forward(x) returns [x, layer0(x), layer1(...), ...] where each layer is
    Linear(+ReLU if index in relu_layers_index, +Dropout if in
    dropout_layers_index; dropout is identity in eval / rate-0 mode).
    """

    def __init__(self, linear_layers_dim, dropout_rate=0.0, relu_layers_index=(),
                 dropout_layers_index=(), key=None, compute_dtype=jnp.float32):
        if key is None:
            key = jax.random.PRNGKey(0)
        self.relu_layers_index = set(relu_layers_index)
        self.dropout_layers_index = set(dropout_layers_index)
        self.dropout_rate = dropout_rate
        self.compute_dtype = compute_dtype
        self.dims = list(linear_layers_dim)
        self.dims_p = [_round_up(d, 128) for d in self.dims]
        n_layers = len(self.dims) - 1
        self.relu_flags = tuple(i in self.relu_layers_index for i in range(n_layers))

        self.weights, self.biases = [], []        # f32 reference params
        self.weights_p, self.biases_p = [], []    # padded compute-dtype params
        for i in range(n_layers):
            din, dout = self.dims[i], self.dims[i + 1]
            key, kw, kb = jax.random.split(key, 3)
            bound = 1.0 / (din ** 0.5)
            # PyTorch Linear init: U(-1/sqrt(in), 1/sqrt(in)) for W (out,in) and b.
            w_torch = jax.random.uniform(kw, (dout, din), jnp.float32,
                                         minval=-bound, maxval=bound)
            b_init = jax.random.uniform(kb, (dout,), jnp.float32,
                                        minval=-bound, maxval=bound)
            w = jnp.asarray(w_torch.T)             # (din, dout)
            self.weights.append(w)
            self.biases.append(b_init)
            # Lane-dense zero-padded copies (padded W rows/cols and b entries are
            # zero, so padded output columns stay exactly 0 through the chain).
            wp = jnp.zeros((self.dims_p[i], self.dims_p[i + 1]),
                           compute_dtype).at[:din, :dout].set(w.astype(compute_dtype))
            bp = jnp.zeros((1, self.dims_p[i + 1]),
                           jnp.float32).at[0, :dout].set(b_init)
            self.weights_p.append(wp)
            self.biases_p.append(bp)

    def forward(self, x, *, force_tiled=False, only_final=False):
        if not self.weights_p:
            return [x]
        outs = _linear_block_forward(
            x, tuple(self.weights_p), tuple(self.biases_p),
            relu_flags=self.relu_flags, dims=tuple(self.dims),
            force_tiled=bool(force_tiled), only_final=bool(only_final))
        # Dropout with rate 0 / eval-mode semantics is the identity; see
        # TODO(synk) in the fused kernel for training-mode dropout.
        return [x] + list(outs)


# --------------------------------- demo --------------------------------------

if __name__ == "__main__":
    key = jax.random.PRNGKey(0)
    batch = 8
    dims = [32, 64, 16]
    model = LinearBlockPallas(dims, dropout_rate=0.0,
                              relu_layers_index=[0], dropout_layers_index=[],
                              key=jax.random.PRNGKey(42))
    x = jax.random.normal(key, (batch, dims[0]), jnp.float32)

    # Fused path (default for these shapes).
    embeddings = model.forward(x)
    for e in embeddings:
        jax.block_until_ready(e)

    # Plain-JAX reference.
    ref = x
    ref_embs = [x]
    for i, (w, b) in enumerate(zip(model.weights, model.biases)):
        ref = ref @ w + b
        if i in model.relu_layers_index:
            ref = jnp.maximum(ref, 0.0)
        ref_embs.append(ref)

    assert len(embeddings) == len(ref_embs)
    for got, want in zip(embeddings, ref_embs):
        assert got.shape == want.shape, (got.shape, want.shape)
        assert jnp.allclose(got, want, atol=1e-3, rtol=1e-3)

    # Tiled fallback path (forced) -- same semantics.
    embeddings_tiled = model.forward(x, force_tiled=True)
    for e in embeddings_tiled:
        jax.block_until_ready(e)
    assert len(embeddings_tiled) == len(ref_embs)
    for got, want in zip(embeddings_tiled, ref_embs):
        assert got.shape == want.shape, (got.shape, want.shape)
        assert jnp.allclose(got, want, atol=1e-3, rtol=1e-3)

    # only_final option: [x, final_activation].
    final_only = model.forward(x, only_final=True)
    jax.block_until_ready(final_only[-1])
    assert len(final_only) == 2
    assert final_only[-1].shape == ref_embs[-1].shape
    assert jnp.allclose(final_only[-1], ref_embs[-1], atol=1e-3, rtol=1e-3)

    # bf16 MXU-operand path (same init key -> same f32 params before cast).
    model_bf16 = LinearBlockPallas(dims, dropout_rate=0.0,
                                   relu_layers_index=[0], dropout_layers_index=[],
                                   key=jax.random.PRNGKey(42),
                                   compute_dtype=jnp.bfloat16)
    embeddings_bf16 = model_bf16.forward(x)
    for e in embeddings_bf16:
        jax.block_until_ready(e)
    for got, want in zip(embeddings_bf16, ref_embs):
        assert got.shape == want.shape, (got.shape, want.shape)
        assert bool(jnp.all(jnp.isfinite(got)))
        assert float(jnp.max(jnp.abs(got - want))) < 0.25  # bf16 tolerance

    print("KERNEL_OK")
</pallas_src>

<mosaic_0001>
module attributes {stable_mosaic.version = 11 : i64} {
  func.func @_fused_block_kernel(%arg0: i32, %arg1: memref<8x128xf32, #tpu.memory_space<vmem>>, %arg2: memref<128x128xf32, #tpu.memory_space<vmem>>, %arg3: memref<1x128xf32, #tpu.memory_space<vmem>>, %arg4: memref<128x128xf32, #tpu.memory_space<vmem>>, %arg5: memref<1x128xf32, #tpu.memory_space<vmem>>, %arg6: memref<8x128xf32, #tpu.memory_space<vmem>>, %arg7: memref<8x128xf32, #tpu.memory_space<vmem>>) attributes {dimension_semantics = [#tpu.dimension_semantics<parallel>], iteration_bounds = array<i64: 1>, scalar_prefetch = 0 : i64, scratch_operands = 0 : i64, tpu.core_type = #tpu.core_type<tc>, window_params = [{transform_indices = @transform_0, window_bounds = array<i64: 8, 128>}, {pipeline_mode = #tpu.pipeline_mode<synchronous>, transform_indices = @transform_1, window_bounds = array<i64: 128, 128>}, {pipeline_mode = #tpu.pipeline_mode<synchronous>, transform_indices = @transform_2, window_bounds = array<i64: 1, 128>}, {pipeline_mode = #tpu.pipeline_mode<synchronous>, transform_indices = @transform_3, window_bounds = array<i64: 128, 128>}, {pipeline_mode = #tpu.pipeline_mode<synchronous>, transform_indices = @transform_4, window_bounds = array<i64: 1, 128>}, {transform_indices = @transform_5, window_bounds = array<i64: 8, 128>}, {transform_indices = @transform_6, window_bounds = array<i64: 8, 128>}]} {
    %c0 = arith.constant 0 : index
    %c0_0 = arith.constant 0 : index
    %0 = vector.load %arg1[%c0, %c0_0] : memref<8x128xf32, #tpu.memory_space<vmem>>, vector<8x128xf32>
    %c0_1 = arith.constant 0 : index
    %c0_2 = arith.constant 0 : index
    %1 = vector.load %arg2[%c0_1, %c0_2] : memref<128x128xf32, #tpu.memory_space<vmem>>, vector<128x128xf32>
    %cst = arith.constant dense<0.000000e+00> : vector<8x128xf32>
    %2 = tpu.matmul %0, %1, %cst {dimension_numbers = #tpu.dot_dimension_numbers<[1], [0], [0], [1], [0, 0, 1, 1], [], []>} : vector<8x128xf32>, vector<128x128xf32>, vector<8x128xf32> -> vector<8x128xf32>
    %c0_3 = arith.constant 0 : index
    %c0_4 = arith.constant 0 : index
    %3 = vector.load %arg3[%c0_3, %c0_4] : memref<1x128xf32, #tpu.memory_space<vmem>>, vector<1x128xf32>
    %4 = vector.broadcast %3 : vector<1x128xf32> to vector<8x128xf32>
    %5 = arith.addf %2, %4 : vector<8x128xf32>
    %cst_5 = arith.constant 0.000000e+00 : f32
    %6 = vector.broadcast %cst_5 : f32 to vector<8x128xf32>
    %7 = arith.maximumf %5, %6 : vector<8x128xf32>
    %c0_6 = arith.constant 0 : index
    %c0_7 = arith.constant 0 : index
    %8 = vector.load %arg6[%c0_6, %c0_7] : memref<8x128xf32, #tpu.memory_space<vmem>>, vector<8x128xf32>
    tpu.vector_store %arg6[%c0_6, %c0_7], %7 {strides = array<i32>} : memref<8x128xf32, #tpu.memory_space<vmem>>, vector<8x128xf32>,
    %c0_8 = arith.constant 0 : index
    %c0_9 = arith.constant 0 : index
    %9 = vector.load %arg4[%c0_8, %c0_9] : memref<128x128xf32, #tpu.memory_space<vmem>>, vector<128x128xf32>
    %cst_10 = arith.constant dense<0.000000e+00> : vector<8x128xf32>
    %10 = tpu.matmul %7, %9, %cst_10 {dimension_numbers = #tpu.dot_dimension_numbers<[1], [0], [0], [1], [0, 0, 1, 1], [], []>} : vector<8x128xf32>, vector<128x128xf32>, vector<8x128xf32> -> vector<8x128xf32>
    %c0_11 = arith.constant 0 : index
    %c0_12 = arith.constant 0 : index
    %11 = vector.load %arg5[%c0_11, %c0_12] : memref<1x128xf32, #tpu.memory_space<vmem>>, vector<1x128xf32>
    %12 = vector.broadcast %11 : vector<1x128xf32> to vector<8x128xf32>
    %13 = arith.addf %10, %12 : vector<8x128xf32>
    %c0_13 = arith.constant 0 : index
    %c0_14 = arith.constant 0 : index
    %14 = vector.load %arg7[%c0_13, %c0_14] : memref<8x128xf32, #tpu.memory_space<vmem>>, vector<8x128xf32>
    tpu.vector_store %arg7[%c0_13, %c0_14], %13 {strides = array<i32>} : memref<8x128xf32, #tpu.memory_space<vmem>>, vector<8x128xf32>,
    return
  }
  func.func @transform_0(%arg0: i32) -> (i32, i32) {
    %c0_i32 = arith.constant 0 : i32
    %c0_i32_0 = arith.constant 0 : i32
    return %arg0, %c0_i32 : i32, i32
  }
  func.func @transform_1(%arg0: i32) -> (i32, i32) {
    %c0_i32 = arith.constant 0 : i32
    %c0_i32_0 = arith.constant 0 : i32
    %c0_i32_1 = arith.constant 0 : i32
    return %c0_i32, %c0_i32_0 : i32, i32
  }
  func.func @transform_2(%arg0: i32) -> (i32, i32) {
    %c0_i32 = arith.constant 0 : i32
    %c0_i32_0 = arith.constant 0 : i32
    %c0_i32_1 = arith.constant 0 : i32
    return %c0_i32, %c0_i32_0 : i32, i32
  }
  func.func @transform_3(%arg0: i32) -> (i32, i32) {
    %c0_i32 = arith.constant 0 : i32
    %c0_i32_0 = arith.constant 0 : i32
    %c0_i32_1 = arith.constant 0 : i32
    return %c0_i32, %c0_i32_0 : i32, i32
  }
  func.func @transform_4(%arg0: i32) -> (i32, i32) {
    %c0_i32 = arith.constant 0 : i32
    %c0_i32_0 = arith.constant 0 : i32
    %c0_i32_1 = arith.constant 0 : i32
    return %c0_i32, %c0_i32_0 : i32, i32
  }
  func.func @transform_5(%arg0: i32) -> (i32, i32) {
    %c0_i32 = arith.constant 0 : i32
    %c0_i32_0 = arith.constant 0 : i32
    return %arg0, %c0_i32 : i32, i32
  }
  func.func @transform_6(%arg0: i32) -> (i32, i32) {
    %c0_i32 = arith.constant 0 : i32
    %c0_i32_0 = arith.constant 0 : i32
    return %arg0, %c0_i32 : i32, i32
  }
}

</mosaic_0001>

<bundles_post_ra>
// kernel: _linear_block_forward.1
= control target key start
LH: loop header
LB: loop body
LE: loop exit
PB: predicated region body
PF: predicated region fallthrough
CT: control target
= control target key end

     0   :  { %12 = vsyncpa [#allocation3], 0  ;;  %s348_s0 = inlined_call_operand.vmem [shape: f32[8,128], index: 0, kind: input, shape index: {}]   ;;  %s349_s1 = inlined_call_operand.hbm [shape: f32[128,128], index: 1, kind: input, shape index: {}]   ;;  %s350_s2 = inlined_call_operand.vmem [shape: f32[1,128], index: 2, kind: input, shape index: {}]   ;;  %s351_s3 = inlined_call_operand.hbm [shape: f32[128,128], index: 3, kind: input, shape index: {}]   ;;  %s352_s4 = inlined_call_operand.vmem [shape: f32[1,128], index: 4, kind: input, shape index: {}]   ;;  %s353_s5 = inlined_call_operand.hbm [shape: f32[8,128], index: 5, kind: output, shape index: {0}]   ;;  %s354_s6 = inlined_call_operand.hbm [shape: f32[8,128], index: 6, kind: output, shape index: {1}]  }
   0x1   :  { %13 = vsyncpa [#allocation6], 0 }
   0x2   :  { %14 = vsyncpa [#allocation4], 0 }
   0x3   :  { %15 = vsyncpa [#allocation9], 0  ;;  %s22_s23 = sshll.u32 %s349_s1, 4  ;;  %s286_s24 = smov [#allocation2]   ;;  %s23_s23 = int_to_ptr.hbm [resolvable:$true] %s22_s23 }
   0x4   :  { %s24_s25 = sshll.u32 %s286_s24, 4  ;;  %s37_s28 = sshll.u32 %s351_s3, 4  ;;  %s25_s25 = int_to_ptr.vmem [resolvable:$true] %s24_s25  ;;  %s38_s28 = int_to_ptr.hbm [resolvable:$true] %s37_s28 }
   0x5   :  { %s287_s29 = smov 128   ;;  %s288_s30 = smov 8  }
   0x6   :  { %30 = dma.hbm_to_vmem [thread:$0]  %s23_s23, 2048, %s25_s25, [#allocation3], %s287_s29, %s287_s29, %s288_s30  }
   0x7   :  { %s289_s7 = smov [#allocation5]  }
   0x8   :  { %s39_s8 = sshll.u32 %s289_s7, 4  ;;  %s40_s8 = int_to_ptr.vmem [resolvable:$true] %s39_s8 }
   0x9   :  { %45 = dma.hbm_to_vmem [thread:$0]  %s38_s28, 2048, %s40_s8, [#allocation6], %s287_s29, %s287_s29, %s288_s30  }
   0xa   :  { %278 = dma.done.wait [#allocation3], 2048  }
   0xb   :  { %279 = vsyncadd [#allocation3], 4294965248 }
   0xc   :  { %280 = dma.done.wait [#allocation6], 2048  }
   0xd   :  { %281 = vsyncadd [#allocation6], 4294965248  ;;  %v72_v0 = vld [vmem:[#allocation2 + $0x78] sm:$0xff]  ;;  %v71_v1 = vld [vmem:[#allocation2 + $0x70] sm:$0xff]  ;;  %s290_s11 = smov [#allocation7]   ;;  %s147_s14 = sshll.u32 %s353_s5, 4  ;;  %s148_s14 = int_to_ptr.hbm [resolvable:$true] %s147_s14 }
   0xe   :  { %77 = vmatpush.msra.mxu0 %v72_v0  ;;  %v70_v2 = vld [vmem:[#allocation2 + $0x68] sm:$0xff]  ;;  %v69_v3 = vld [vmem:[#allocation2 + $0x60] sm:$0xff]  ;;  %v114_v4 = vld [vmem:[#allocation5 + $0x78] sm:$0xff]  ;;  %s145_s12 = sshll.u32 %s290_s11, 4  ;;  %s291_s17 = smov [#allocation8]   ;;  %s146_s12 = int_to_ptr.vmem [resolvable:$true] %s145_s12 }
   0xf   :  { %v68_v5 = vld [vmem:[#allocation2 + $0x58] sm:$0xff]  ;;  %119 = vmatpush.msra.mxu1 %v114_v4  ;;  %v113_v6 = vld [vmem:[#allocation5 + $0x70] sm:$0xff]  ;;  %v112_v7 = vld [vmem:[#allocation5 + $0x68] sm:$0xff]  ;;  %s158_s20 = sshll.u32 %s354_s6, 4  ;;  %s159_s20 = int_to_ptr.hbm [resolvable:$true] %s158_s20 }
  0x10   :  { %78 = vmatpush.msra.mxu0 %v71_v1  ;;  %v67_v8 = vld [vmem:[#allocation2 + $0x50] sm:$0xff]  ;;  %v111_v9 = vld [vmem:[#allocation5 + $0x60] sm:$0xff]  ;;  %v66_v10 = vld [vmem:[#allocation2 + $0x48] sm:$0xff] }
  0x11   :  { %120 = vmatpush.msra.mxu1 %v113_v6  ;;  %v110_v11 = vld [vmem:[#allocation5 + $0x58] sm:$0xff]  ;;  %v65_v12 = vld [vmem:[#allocation2 + $0x40] sm:$0xff]  ;;  %v109_v13 = vld [vmem:[#allocation5 + $0x50] sm:$0xff] }
  0x12   :  { %79 = vmatpush.msra.mxu0 %v70_v2  ;;  %v64_v14 = vld [vmem:[#allocation2 + $0x38] sm:$0xff]  ;;  %v108_v15 = vld [vmem:[#allocation5 + $0x48] sm:$0xff]  ;;  %v63_v16 = vld [vmem:[#allocation2 + $0x30] sm:$0xff] }
  0x13   :  { %121 = vmatpush.msra.mxu1 %v112_v7  ;;  %v107_v17 = vld [vmem:[#allocation5 + $0x40] sm:$0xff]  ;;  %v62_v18 = vld [vmem:[#allocation2 + $0x28] sm:$0xff]  ;;  %v106_v19 = vld [vmem:[#allocation5 + $0x38] sm:$0xff] }
  0x14   :  { %80 = vmatpush.msra.mxu0 %v69_v3  ;;  %v61_v20 = vld [vmem:[#allocation2 + $0x20] sm:$0xff]  ;;  %v105_v21 = vld [vmem:[#allocation5 + $0x30] sm:$0xff]  ;;  %v60_v22 = vld [vmem:[#allocation2 + $0x18] sm:$0xff] }
  0x15   :  { %122 = vmatpush.msra.mxu1 %v111_v9  ;;  %v104_v23 = vld [vmem:[#allocation5 + $0x28] sm:$0xff]  ;;  %v59_v24 = vld [vmem:[#allocation2 + $0x10] sm:$0xff]  ;;  %v103_v25 = vld [vmem:[#allocation5 + $0x20] sm:$0xff] }
  0x16   :  { %81 = vmatpush.msra.mxu0 %v68_v5  ;;  %v58_v26 = vld [vmem:[#allocation2 + $0x8] sm:$0xff]  ;;  %v102_v27 = vld [vmem:[#allocation5 + $0x18] sm:$0xff]  ;;  %v57_v28 = vld [vmem:[#allocation2] sm:$0xff] }
  0x17   :  { %123 = vmatpush.msra.mxu1 %v110_v11  ;;  %v56_v29 = vld [vmem:[%s348_s0] sm:$0xff]  ;;  %v101_v30 = vld [vmem:[#allocation5 + $0x10] sm:$0xff]  ;;  %v100_v31 = vld [vmem:[#allocation5 + $0x8] sm:$0xff] }
  0x18   :  { %82 = vmatpush.msra.mxu0 %v67_v8  ;;  %v99_v32 = vld [vmem:[#allocation5] sm:$0xff] }
  0x19   :  { %124 = vmatpush.msra.mxu1 %v109_v13  ;;  %v180_v33 = vld [vmem:[%s350_s2] ss:$0 sm:$0xff]  ;;  %s156_s2 = sshll.u32 %s291_s17, 4  ;;  %s157_s2 = int_to_ptr.vmem [resolvable:$true] %s156_s2 }
  0x1a   :  { %83 = vmatpush.msra.mxu0 %v66_v10  ;;  %v181_v37 = vld [vmem:[%s352_s4] ss:$0 sm:$0xff] }
  0x1b   :  { %125 = vmatpush.msra.mxu1 %v108_v15 }
  0x1c   :  { %84 = vmatpush.msra.mxu0 %v65_v12 }
  0x1d   :  { %126 = vmatpush.msra.mxu1 %v107_v17 }
  0x1e   :  { %85 = vmatpush.msra.mxu0 %v64_v14 }
  0x1f   :  { %127 = vmatpush.msra.mxu1 %v106_v19 }
  0x20   :  { %86 = vmatpush.msra.mxu0 %v63_v16 }
  0x21   :  { %128 = vmatpush.msra.mxu1 %v105_v21 }
  0x22   :  { %87 = vmatpush.msra.mxu0 %v62_v18 }
  0x23   :  { %129 = vmatpush.msra.mxu1 %v104_v23 }
  0x24   :  { %88 = vmatpush.msra.mxu0 %v61_v20 }
  0x25   :  { %130 = vmatpush.msra.mxu1 %v103_v25 }
  0x26   :  { %89 = vmatpush.msra.mxu0 %v60_v22 }
  0x27   :  { %131 = vmatpush.msra.mxu1 %v102_v27 }
  0x28   :  { %90 = vmatpush.msra.mxu0 %v59_v24 }
  0x29   :  { %132 = vmatpush.msra.mxu1 %v101_v30 }
  0x2a   :  { %91 = vmatpush.msra.mxu0 %v58_v26 }
  0x2b   :  { %133 = vmatpush.msra.mxu1 %v100_v31 }
  0x2c   :  { %92 = vmatpush.msra.mxu0 %v57_v28 }
  0x2d   :  { %93 = vmatmul.f32.vlgmr.msra.gmra.mxu0 %v56_v29  ;;  %134 = vmatpush.msra.mxu1 %v99_v32 }
  0xaa   :  { %v94_v34 = vpop.f32.mrf.mxu0 }
  0xab   :  { %v95_v35 = vadd.f32 %v180_v33, %v94_v34 }
  0xad   :  { %v97_v36 = vmax.f32 %v95_v35, 0.0 }
  0xaf   :  { %98 = vst [vmem:[#allocation7] sm:$0xff] %v97_v36  ;;  %135 = vmatmul.f32.vlgmr.msra.gmra.mxu1 %v97_v36 }
  0xb0   :  { %150 = dma.vmem_to_hbm [thread:$0]  %s146_s12, 128, %s148_s14, [#allocation4]  }
 0x12c   :  { %v136_v38 = vpop.f32.mrf.mxu1 }
 0x12d   :  { %v137_v39 = vadd.f32 %v181_v37, %v136_v38 }
 0x12f   :  { %139 = vst [vmem:[#allocation8] sm:$0xff] %v137_v39 }
 0x130   :  { %161 = dma.vmem_to_hbm [thread:$0]  %s157_s2, 128, %s159_s20, [#allocation9]  }
 0x131   :  { %282 = dma.done.wait [#allocation4], 128  }
 0x132   :  { %283 = vsyncadd [#allocation4], 4294967168 }
 0x133   :  { %284 = dma.done.wait [#allocation9], 128  }
 0x134   :  { %285 = vsyncadd [#allocation9], 4294967168 }
 0x135   :  { %170 = vsyncpa [#allocation3], 1 }
 0x136   :  { %171 = vsyncpa [#allocation6], 1 }
 0x137   :  { %172 = vsyncpa [#allocation4], 1 }
 0x138   :  { %173 = vsyncpa [#allocation9], 1 }

</bundles_post_ra>
